<compile_context>
chip_gen: v5e
topology: v5e:2x2
jax: 0.10.0
libtpu: 0.0.40
codegen_flags: <defaults>
</compile_context>

<pallas_src>
import functools

import jax
import jax.numpy as jnp
from jax import lax
from jax.experimental import pallas as pl
from jax.experimental.pallas import tpu as pltpu


def _round_up(v, m):
    return ((v + m - 1) // m) * m


def _pick_tile(dim, target, align):
    """Largest multiple of `align` that divides `dim` and is <= max(target, align).

    `dim` must itself be a multiple of `align`, so the loop always terminates
    (worst case returns `align`).
    """
    t = min((max(target, align) // align) * align, dim)
    while dim % t != 0:
        t -= align
    return t


def _matmul_nt_kernel(x_ref, w_ref, o_ref):
    """Computes one (tm, tn) f32 output tile, accumulating over the K grid axis.

    x_ref: (tm, tk) activation tile
    w_ref: (tn, tk) weight tile, native nn.Linear layout (out_features, in_features)
    o_ref: (tm, tn) f32 output tile, resident across the K axis (index_map ignores k)
    """
    k = pl.program_id(2)

    # x @ w.T on the MXU: contract x's dim 1 with w's dim 1 — no transpose copy.
    part = lax.dot_general(
        x_ref[...],
        w_ref[...],
        dimension_numbers=(((1,), (1,)), ((), ())),
        preferred_element_type=jnp.float32,
    )

    @pl.when(k == 0)
    def _first():
        o_ref[...] = part          # overwrite: no zero-init pass needed

    @pl.when(k != 0)
    def _accumulate():
        o_ref[...] += part


@functools.partial(
    jax.jit, static_argnames=("embed_dim", "output_dim", "tm", "tn", "tk")
)
def linear_projection_ndim(x, weight, embed_dim, output_dim,
                           *, tm=512, tn=1024, tk=512):
    """Forward pass of LinearProjectionNDim.

    Args:
      x:      (batch, input_dim) float32
      weight: (embed_dim*output_dim, input_dim) float32 (PyTorch nn.Linear layout)
    Returns:
      (batch, embed_dim, output_dim) float32
    """
    batch, input_dim = x.shape
    out_features, in_features = weight.shape
    assert out_features == embed_dim * output_dim
    assert in_features == input_dim

    # --- tile / padding selection -------------------------------------------
    # Alignment-only padding for the weight (128 lanes / K, 128 rows / N);
    # tiles are exact divisors of the aligned sizes so the weight never gets a
    # tile-multiple padded HBM copy.  x is cheap: pad M to the tile multiple.
    m_pad = _round_up(batch, 8)
    k_pad = _round_up(input_dim, 128)
    n_pad = _round_up(out_features, 128)

    tm = min(tm, m_pad)                     # both multiples of 8
    tk = _pick_tile(k_pad, tk, 128)
    tn = _pick_tile(n_pad, tn, 128)

    # v7x has 2 TensorCores sharded over the "parallel" axes: make sure there
    # are >= 2 parallel iterations when the problem is big enough.
    if m_pad // tm <= 1 and n_pad // tn <= 1:
        if n_pad >= 256:
            tn = _pick_tile(n_pad, n_pad // 2, 128)
        elif m_pad >= 16:
            tm = _round_up((m_pad + 1) // 2, 8)

    m_pad = _round_up(m_pad, tm)
    grid = (m_pad // tm, n_pad // tn, k_pad // tk)

    # --- operand padding (zero rows/cols are a matmul no-op) ------------------
    x_p = x
    if m_pad != batch or k_pad != input_dim:
        x_p = jnp.pad(x, ((0, m_pad - batch), (0, k_pad - input_dim)))
    w_p = weight
    if n_pad != out_features or k_pad != input_dim:
        w_p = jnp.pad(weight, ((0, n_pad - out_features), (0, k_pad - input_dim)))

    # --- cost estimate (counts re-streaming of x over N tiles / W over M tiles)
    elt = jnp.dtype(x.dtype).itemsize
    gm, gn, _ = grid
    cost = pl.CostEstimate(
        flops=2 * m_pad * n_pad * k_pad,
        bytes_accessed=elt * (gn * m_pad * k_pad + gm * n_pad * k_pad
                              + m_pad * n_pad),
        transcendentals=0,
    )

    # --- VMEM budget: 2x double-buffered x/W/out tiles + margin, 32..60 MiB ---
    vmem_bytes = 2 * 4 * (tm * tk + tn * tk + tm * tn) + (8 << 20)
    vmem_limit = min(max(vmem_bytes, 32 << 20), 60 << 20)

    y = pl.pallas_call(
        _matmul_nt_kernel,
        out_shape=jax.ShapeDtypeStruct((m_pad, n_pad), jnp.float32),
        grid_spec=pltpu.PrefetchScalarGridSpec(
            num_scalar_prefetch=0,
            grid=grid,
            in_specs=[
                pl.BlockSpec((tm, tk), lambda i, j, k: (i, k)),  # x tile
                pl.BlockSpec((tn, tk), lambda i, j, k: (j, k)),  # weight tile
            ],
            out_specs=pl.BlockSpec((tm, tn), lambda i, j, k: (i, j)),
        ),
        compiler_params=pltpu.CompilerParams(
            dimension_semantics=("parallel", "parallel", "arbitrary"),
            vmem_limit_bytes=vmem_limit,
        ),
        cost_estimate=cost,
    )(x_p, w_p)

    # Glue: drop padding and reshape to (batch, embed_dim, output_dim).
    # Row-major reshape matches PyTorch's .reshape(-1, embed_dim, output_dim).
    return y[:batch, :out_features].reshape(batch, embed_dim, output_dim)


if __name__ == "__main__":
    # Small shapes consistent with the module's forward signature.
    batch = 8
    input_dim = 32
    embed_dim = 4
    output_dim = 16
    out_features = embed_dim * output_dim

    key = jax.random.PRNGKey(0)
    kx, kw = jax.random.split(key)

    x = jax.random.normal(kx, (batch, input_dim), dtype=jnp.float32)
    # Deterministic synthetic weight init (nn.Linear-style uniform bound).
    bound = 1.0 / (input_dim ** 0.5)
    weight = jax.random.uniform(
        kw, (out_features, input_dim), dtype=jnp.float32,
        minval=-bound, maxval=bound,
    )

    out = linear_projection_ndim(x, weight, embed_dim, output_dim)
    out = jax.block_until_ready(out)

    # Reference check against plain JAX (same math as torch: x @ W.T then reshape).
    ref = (x @ weight.T).reshape(batch, embed_dim, output_dim)
    assert out.shape == (batch, embed_dim, output_dim)
    assert jnp.allclose(out, ref, atol=1e-5, rtol=1e-5)

    print("KERNEL_OK")
</pallas_src>

<mosaic_0001>
module attributes {stable_mosaic.version = 11 : i64} {
  func.func @_matmul_nt_kernel(%arg0: i32, %arg1: i32, %arg2: i32, %arg3: memref<8x128xf32, #tpu.memory_space<vmem>>, %arg4: memref<128x128xf32, #tpu.memory_space<vmem>>, %arg5: memref<8x128xf32, #tpu.memory_space<vmem>>) attributes {dimension_semantics = [#tpu.dimension_semantics<parallel>, #tpu.dimension_semantics<parallel>, #tpu.dimension_semantics<arbitrary>], iteration_bounds = array<i64: 1, 1, 1>, scalar_prefetch = 0 : i64, scratch_operands = 0 : i64, tpu.core_type = #tpu.core_type<tc>, window_params = [{transform_indices = @transform_0, window_bounds = array<i64: 8, 128>}, {transform_indices = @transform_1, window_bounds = array<i64: 128, 128>}, {transform_indices = @transform_2, window_bounds = array<i64: 8, 128>}]} {
    %c0 = arith.constant 0 : index
    %c0_0 = arith.constant 0 : index
    %0 = vector.load %arg3[%c0, %c0_0] : memref<8x128xf32, #tpu.memory_space<vmem>>, vector<8x128xf32>
    %c0_1 = arith.constant 0 : index
    %c0_2 = arith.constant 0 : index
    %1 = vector.load %arg4[%c0_1, %c0_2] : memref<128x128xf32, #tpu.memory_space<vmem>>, vector<128x128xf32>
    %cst = arith.constant dense<0.000000e+00> : vector<8x128xf32>
    %2 = tpu.matmul %0, %1, %cst {dimension_numbers = #tpu.dot_dimension_numbers<[1], [1], [0], [0], [0, 0, 1, 0], [], []>} : vector<8x128xf32>, vector<128x128xf32>, vector<8x128xf32> -> vector<8x128xf32>
    %c0_i32 = arith.constant 0 : i32
    %3 = arith.cmpi eq, %arg2, %c0_i32 : i32
    %4 = arith.extui %3 : i1 to i32
    %c0_i32_3 = arith.constant 0 : i32
    %5 = arith.cmpi ne, %4, %c0_i32_3 : i32
    scf.if %5 {
      %c0_6 = arith.constant 0 : index
      %c0_7 = arith.constant 0 : index
      %9 = vector.load %arg5[%c0_6, %c0_7] : memref<8x128xf32, #tpu.memory_space<vmem>>, vector<8x128xf32>
      tpu.vector_store %arg5[%c0_6, %c0_7], %2 {strides = array<i32>} : memref<8x128xf32, #tpu.memory_space<vmem>>, vector<8x128xf32>,
    } else {
    }
    %c0_i32_4 = arith.constant 0 : i32
    %6 = arith.cmpi ne, %arg2, %c0_i32_4 : i32
    %7 = arith.extui %6 : i1 to i32
    %c0_i32_5 = arith.constant 0 : i32
    %8 = arith.cmpi ne, %7, %c0_i32_5 : i32
    scf.if %8 {
      %c0_6 = arith.constant 0 : index
      %c0_7 = arith.constant 0 : index
      %9 = vector.load %arg5[%c0_6, %c0_7] : memref<8x128xf32, #tpu.memory_space<vmem>>, vector<8x128xf32>
      %10 = arith.addf %9, %2 : vector<8x128xf32>
      %c0_8 = arith.constant 0 : index
      %c0_9 = arith.constant 0 : index
      %11 = vector.load %arg5[%c0_8, %c0_9] : memref<8x128xf32, #tpu.memory_space<vmem>>, vector<8x128xf32>
      tpu.vector_store %arg5[%c0_8, %c0_9], %10 {strides = array<i32>} : memref<8x128xf32, #tpu.memory_space<vmem>>, vector<8x128xf32>,
    } else {
    }
    return
  }
  func.func @transform_0(%arg0: i32, %arg1: i32, %arg2: i32) -> (i32, i32) {
    %c0_i32 = arith.constant 0 : i32
    return %arg0, %arg2 : i32, i32
  }
  func.func @transform_1(%arg0: i32, %arg1: i32, %arg2: i32) -> (i32, i32) {
    %c0_i32 = arith.constant 0 : i32
    return %arg1, %arg2 : i32, i32
  }
  func.func @transform_2(%arg0: i32, %arg1: i32, %arg2: i32) -> (i32, i32) {
    %c0_i32 = arith.constant 0 : i32
    return %arg0, %arg1 : i32, i32
  }
}

</mosaic_0001>

<bundles_post_ra>
// kernel: linear_projection_ndim.1
= control target key start
LH: loop header
LB: loop body
LE: loop exit
PB: predicated region body
PF: predicated region fallthrough
CT: control target
= control target key end

     0   :  { %s133_s1 = inlined_call_operand.vmem [shape: f32[128,128], index: 1, kind: input, shape index: {}]   ;;  %s134_s0 = inlined_call_operand.vmem [shape: f32[8,128], index: 0, kind: input, shape index: {}]   ;;  %s135_s2 = inlined_call_operand.vmem [shape: f32[8,128], index: 2, kind: output, shape index: {}]  }
   0x1   :  { %v27_v0 = vld [vmem:[%s133_s1 + $0x78] sm:$0xff]  ;;  %v26_v1 = vld [vmem:[%s133_s1 + $0x70] sm:$0xff]  ;;  %v25_v2 = vld [vmem:[%s133_s1 + $0x68] sm:$0xff] }
   0x2   :  { %28 = vmatpush.xpose.msra.mxu0 %v27_v0  ;;  %v24_v3 = vld [vmem:[%s133_s1 + $0x60] sm:$0xff]  ;;  %v23_v4 = vld [vmem:[%s133_s1 + $0x58] sm:$0xff]  ;;  %v22_v5 = vld [vmem:[%s133_s1 + $0x50] sm:$0xff] }
   0x3   :  { %v21_v6 = vld [vmem:[%s133_s1 + $0x48] sm:$0xff]  ;;  %v20_v7 = vld [vmem:[%s133_s1 + $0x40] sm:$0xff]  ;;  %v19_v8 = vld [vmem:[%s133_s1 + $0x38] sm:$0xff] }
   0x4   :  { %v18_v9 = vld [vmem:[%s133_s1 + $0x30] sm:$0xff]  ;;  %v17_v10 = vld [vmem:[%s133_s1 + $0x28] sm:$0xff]  ;;  %v16_v11 = vld [vmem:[%s133_s1 + $0x20] sm:$0xff] }
   0x5   :  { %v15_v12 = vld [vmem:[%s133_s1 + $0x18] sm:$0xff]  ;;  %v14_v13 = vld [vmem:[%s133_s1 + $0x10] sm:$0xff]  ;;  %v13_v14 = vld [vmem:[%s133_s1 + $0x8] sm:$0xff] }
   0x6   :  { %29 = vmatpush.xpose.msra.mxu0 %v26_v1  ;;  %v12_v15 = vld [vmem:[%s133_s1] sm:$0xff] }
   0x7   :  { %v11_v16 = vld [vmem:[%s134_s0] sm:$0xff] }
   0xa   :  { %30 = vmatpush.xpose.msra.mxu0 %v25_v2 }
   0xe   :  { %31 = vmatpush.xpose.msra.mxu0 %v24_v3 }
  0x12   :  { %32 = vmatpush.xpose.msra.mxu0 %v23_v4 }
  0x16   :  { %33 = vmatpush.xpose.msra.mxu0 %v22_v5 }
  0x1a   :  { %34 = vmatpush.xpose.msra.mxu0 %v21_v6 }
  0x1e   :  { %35 = vmatpush.xpose.msra.mxu0 %v20_v7 }
  0x22   :  { %36 = vmatpush.xpose.msra.mxu0 %v19_v8 }
  0x26   :  { %37 = vmatpush.xpose.msra.mxu0 %v18_v9 }
  0x2a   :  { %38 = vmatpush.xpose.msra.mxu0 %v17_v10 }
  0x2e   :  { %39 = vmatpush.xpose.msra.mxu0 %v16_v11 }
  0x32   :  { %40 = vmatpush.xpose.msra.mxu0 %v15_v12 }
  0x36   :  { %41 = vmatpush.xpose.msra.mxu0 %v14_v13 }
  0x3a   :  { %42 = vmatpush.xpose.msra.mxu0 %v13_v14 }
  0x3e   :  { %43 = vmatpush.xpose.msra.mxu0 %v12_v15 }
  0x41   :  { %44 = vmatmul.f32.vlgmr.msra.gmra.mxu0 %v11_v16 }
  0xbe   :  { %v45_v17 = vpop.f32.mrf.mxu0 }
  0xbf   :  { %52 = vst [vmem:[%s135_s2] sm:$0xff] %v45_v17 }

</bundles_post_ra>
